<compile_context>
chip_gen: v5e
topology: v5e:2x2
jax: 0.10.0
libtpu: 0.0.40
codegen_flags: <defaults>
</compile_context>

<pallas_src>
import jax
import jax.numpy as jnp
from jax.experimental import pallas as pl
from jax.experimental.pallas import tpu as pltpu


# ---------------------------------------------------------------------------
# TT-Matrix parameter construction (mirrors random_tt_matrix + uniform_(-0.1,
# 0.1) init in the PyTorch module, deterministic via JAX PRNG).
# ---------------------------------------------------------------------------
def random_tt_matrix(shape, rank, key):
    """shape = [in_dims, out_dims]; factor k has shape (r_{k-1}, m_k, n_k, r_k)."""
    in_shape, out_shape = shape
    d = len(in_shape)
    ranks = [1] + [rank] * (d - 1) + [1]
    keys = jax.random.split(key, d)
    factors = []
    for k in range(d):
        f = jax.random.uniform(
            keys[k],
            (ranks[k], in_shape[k], out_shape[k], ranks[k + 1]),
            minval=-0.1, maxval=0.1, dtype=jnp.float32,
        )
        factors.append(f)
    return factors


def tt_matrix_to_full(factors):
    """Reconstruct the full tensor of shape (m1..md, n1..nd) from TT-Matrix cores
    (same semantics as tensorly.tt_matrix_to_tensor used by the PyTorch module)."""
    d = len(factors)
    res = factors[0]  # (1, m1, n1, r1)
    for i in range(1, d):
        f = factors[i]
        r_i = f.shape[0]
        res = jnp.dot(res.reshape(-1, r_i), f.reshape(r_i, -1))
    in_dims = [f.shape[1] for f in factors]
    out_dims = [f.shape[2] for f in factors]
    # interleaved shape (m1, n1, m2, n2, ...), then permute to (m1..md, n1..nd)
    full_shape = tuple(x for pair in zip(in_dims, out_dims) for x in pair)
    res = res.reshape(full_shape)
    order = list(range(0, 2 * d, 2)) + list(range(1, 2 * d, 2))
    return jnp.transpose(res, order)


# ---------------------------------------------------------------------------
# Pallas kernel: tiled y = x @ W with f32 VMEM accumulator.
# ---------------------------------------------------------------------------
def _ttm_matmul_kernel(x_ref, w_ref, o_ref, acc_ref):
    @pl.when(pl.program_id(2) == 0)
    def _init():
        acc_ref[...] = jnp.zeros_like(acc_ref)

    acc_ref[...] += jnp.dot(
        x_ref[...], w_ref[...], preferred_element_type=jnp.float32
    )

    @pl.when(pl.program_id(2) == pl.num_programs(2) - 1)
    def _store():
        o_ref[...] = acc_ref[...].astype(o_ref.dtype)


def _round_up(v, m):
    return ((v + m - 1) // m) * m


def ttm_matmul(x, w, *, tm_cap=256, tn_cap=256, tk_cap=512,
               compute_dtype=jnp.bfloat16):
    """y = x @ w on the MXU. Pads M/K/N to tile multiples (zero pad is exact for
    matmul) and slices the result back, so arbitrary shapes work."""
    M, K = x.shape
    K2, N = w.shape
    assert K == K2
    out_dtype = x.dtype

    # 128-aligned tiles (lane-dense output), 256-class on the M/N matmul dims.
    tm = min(tm_cap, _round_up(M, 8))
    tn = min(tn_cap, _round_up(N, 128))
    tk = min(tk_cap, _round_up(K, 128))
    Mp, Kp, Np = _round_up(M, tm), _round_up(K, tk), _round_up(N, tn)

    xc = x.astype(compute_dtype)
    wc = w.astype(compute_dtype)
    if (Mp, Kp) != (M, K):
        xc = jnp.pad(xc, ((0, Mp - M), (0, Kp - K)))
    if (Kp, Np) != (K, N):
        wc = jnp.pad(wc, ((0, Kp - K), (0, Np - N)))

    grid = (Mp // tm, Np // tn, Kp // tk)

    # VMEM working set: double-buffered operand tiles + f32 accumulator +
    # double-buffered output tile. Keep it well inside the default scoped VMEM
    # on every generation (v5e 16 MiB, v6e 32 MiB, v7x 32 MiB of 64 MiB phys),
    # so no vmem_limit_bytes override is required.
    c_item = jnp.dtype(compute_dtype).itemsize
    o_item = jnp.dtype(out_dtype).itemsize
    vmem_working_set = (2 * (tm * tk + tk * tn) * c_item
                        + tm * tn * 4
                        + 2 * tm * tn * o_item)
    assert vmem_working_set < 16 * 1024 * 1024, "tile caps exceed VMEM budget"

    cost = pl.CostEstimate(
        flops=2 * Mp * Np * Kp,
        transcendentals=0,
        bytes_accessed=(Mp * Kp + Kp * Np) * c_item + Mp * Np * o_item,
    )

    out = pl.pallas_call(
        _ttm_matmul_kernel,
        out_shape=jax.ShapeDtypeStruct((Mp, Np), out_dtype),
        grid_spec=pltpu.PrefetchScalarGridSpec(
            num_scalar_prefetch=0,
            grid=grid,
            in_specs=[
                pl.BlockSpec((tm, tk), lambda i, j, k: (i, k)),
                pl.BlockSpec((tk, tn), lambda i, j, k: (k, j)),
            ],
            out_specs=pl.BlockSpec((tm, tn), lambda i, j, k: (i, j)),
            scratch_shapes=[pltpu.VMEM((tm, tn), jnp.float32)],
        ),
        compiler_params=pltpu.CompilerParams(
            dimension_semantics=("parallel", "parallel", "arbitrary")),
        cost_estimate=cost,
    )(xc, wc)

    if (Mp, Np) != (M, N):
        out = out[:M, :N]
    return out


def ttm_layer_forward(x, factors, *, use_pallas=None,
                      compute_dtype=jnp.bfloat16):
    """Matches TTMLayer.forward: W = tt_matrix_to_tensor(factors).reshape(in, -1); x @ W."""
    # TODO(synk): fuse the TT-core contraction into the matmul kernel (keep the
    # tiny cores resident in VMEM and build each W tile on the fly) to avoid
    # the K*N HBM round-trip of materializing W every forward call.
    W = tt_matrix_to_full(factors).reshape(x.shape[1], -1)
    M, K = x.shape
    N = W.shape[1]
    if use_pallas is None:
        # Below MXU-class sizes the pallas_call fixed cost dominates; let XLA's
        # fused dot handle it.
        use_pallas = (M >= 128 and K >= 128 and N >= 128)
    if not use_pallas:
        return jnp.dot(
            x.astype(compute_dtype), W.astype(compute_dtype),
            preferred_element_type=jnp.float32,
        ).astype(x.dtype)
    return ttm_matmul(x, W, compute_dtype=compute_dtype)


# ---------------------------------------------------------------------------
if __name__ == "__main__":
    key = jax.random.PRNGKey(0)
    kx1, kf1, kx2, kf2 = jax.random.split(key, 4)

    # --- Test 1: MXU-friendly sizes; multiple grid steps on the batch axis ---
    tt_shape = [[16, 16], [16, 16]]     # in_features = 256, out_features = 256
    rank = 3
    factors = random_tt_matrix(tt_shape, rank, kf1)
    batch, in_features = 512, 256
    x = jax.random.normal(kx1, (batch, in_features), dtype=jnp.float32)

    out = ttm_layer_forward(x, factors, use_pallas=True)
    jax.block_until_ready(out)

    W_ref = tt_matrix_to_full(factors).reshape(in_features, -1)
    ref_bf16 = jnp.dot(x.astype(jnp.bfloat16), W_ref.astype(jnp.bfloat16),
                       preferred_element_type=jnp.float32).astype(jnp.float32)
    ref_f32 = x @ W_ref
    assert out.shape == (batch, W_ref.shape[1])
    assert jnp.allclose(out, ref_bf16, atol=1e-3, rtol=1e-3)   # kernel mechanics
    assert jnp.allclose(out, ref_f32, atol=2e-2, rtol=2e-2)    # bf16-operand error bound

    # --- Test 2: non-aligned TT dims / batch exercise the padding tail path ---
    tt_shape2 = [[4, 6], [5, 7]]        # in_features = 24, out_features = 35
    factors2 = random_tt_matrix(tt_shape2, 2, kf2)
    x2 = jax.random.normal(kx2, (10, 24), dtype=jnp.float32)
    out2 = ttm_layer_forward(x2, factors2, use_pallas=True)
    jax.block_until_ready(out2)

    W2 = tt_matrix_to_full(factors2).reshape(24, -1)
    ref2 = jnp.dot(x2.astype(jnp.bfloat16), W2.astype(jnp.bfloat16),
                   preferred_element_type=jnp.float32).astype(jnp.float32)
    assert out2.shape == (10, 35)
    assert jnp.allclose(out2, ref2, atol=1e-3, rtol=1e-3)

    print("KERNEL_OK")
</pallas_src>

<mosaic_0001>
module attributes {stable_mosaic.version = 11 : i64} {
  func.func @_ttm_matmul_kernel(%arg0: i32, %arg1: i32, %arg2: i32, %arg3: memref<256x256xbf16, #tpu.memory_space<vmem>>, %arg4: memref<256x256xbf16, #tpu.memory_space<vmem>>, %arg5: memref<256x256xf32, #tpu.memory_space<vmem>>, %arg6: memref<256x256xf32, #tpu.memory_space<vmem>>) attributes {dimension_semantics = [#tpu.dimension_semantics<parallel>, #tpu.dimension_semantics<parallel>, #tpu.dimension_semantics<arbitrary>], iteration_bounds = array<i64: 2, 1, 1>, scalar_prefetch = 0 : i64, scratch_operands = 1 : i64, tpu.core_type = #tpu.core_type<tc>, window_params = [{transform_indices = @transform_0, window_bounds = array<i64: 256, 256>}, {transform_indices = @transform_1, window_bounds = array<i64: 256, 256>}, {transform_indices = @transform_2, window_bounds = array<i64: 256, 256>}]} {
    %c0_i32 = arith.constant 0 : i32
    %0 = arith.cmpi eq, %arg2, %c0_i32 : i32
    %1 = arith.extui %0 : i1 to i32
    %c0_i32_0 = arith.constant 0 : i32
    %2 = arith.cmpi ne, %1, %c0_i32_0 : i32
    scf.if %2 {
      %cst_10 = arith.constant 0.000000e+00 : f32
      %12 = vector.broadcast %cst_10 : f32 to vector<256x256xf32>
      %c0_11 = arith.constant 0 : index
      %c0_12 = arith.constant 0 : index
      %13 = vector.load %arg6[%c0_11, %c0_12] : memref<256x256xf32, #tpu.memory_space<vmem>>, vector<256x256xf32>
      tpu.vector_store %arg6[%c0_11, %c0_12], %12 {strides = array<i32>} : memref<256x256xf32, #tpu.memory_space<vmem>>, vector<256x256xf32>,
    } else {
    }
    %c0 = arith.constant 0 : index
    %c0_1 = arith.constant 0 : index
    %3 = vector.load %arg6[%c0, %c0_1] : memref<256x256xf32, #tpu.memory_space<vmem>>, vector<256x256xf32>
    %c0_2 = arith.constant 0 : index
    %c0_3 = arith.constant 0 : index
    %4 = vector.load %arg3[%c0_2, %c0_3] : memref<256x256xbf16, #tpu.memory_space<vmem>>, vector<256x256xbf16>
    %c0_4 = arith.constant 0 : index
    %c0_5 = arith.constant 0 : index
    %5 = vector.load %arg4[%c0_4, %c0_5] : memref<256x256xbf16, #tpu.memory_space<vmem>>, vector<256x256xbf16>
    %cst = arith.constant dense<0.000000e+00> : vector<256x256xf32>
    %6 = tpu.matmul %4, %5, %cst {dimension_numbers = #tpu.dot_dimension_numbers<[1], [0], [0], [1], [0, 0, 1, 1], [], []>} : vector<256x256xbf16>, vector<256x256xbf16>, vector<256x256xf32> -> vector<256x256xf32>
    %7 = arith.addf %3, %6 : vector<256x256xf32>
    %c0_6 = arith.constant 0 : index
    %c0_7 = arith.constant 0 : index
    %8 = vector.load %arg6[%c0_6, %c0_7] : memref<256x256xf32, #tpu.memory_space<vmem>>, vector<256x256xf32>
    tpu.vector_store %arg6[%c0_6, %c0_7], %7 {strides = array<i32>} : memref<256x256xf32, #tpu.memory_space<vmem>>, vector<256x256xf32>,
    %c0_i32_8 = arith.constant 0 : i32
    %9 = arith.cmpi eq, %arg2, %c0_i32_8 : i32
    %10 = arith.extui %9 : i1 to i32
    %c0_i32_9 = arith.constant 0 : i32
    %11 = arith.cmpi ne, %10, %c0_i32_9 : i32
    scf.if %11 {
      %c0_10 = arith.constant 0 : index
      %c0_11 = arith.constant 0 : index
      %12 = vector.load %arg6[%c0_10, %c0_11] : memref<256x256xf32, #tpu.memory_space<vmem>>, vector<256x256xf32>
      %c0_12 = arith.constant 0 : index
      %c0_13 = arith.constant 0 : index
      %13 = vector.load %arg5[%c0_12, %c0_13] : memref<256x256xf32, #tpu.memory_space<vmem>>, vector<256x256xf32>
      tpu.vector_store %arg5[%c0_12, %c0_13], %12 {strides = array<i32>} : memref<256x256xf32, #tpu.memory_space<vmem>>, vector<256x256xf32>,
    } else {
    }
    return
  }
  func.func @transform_0(%arg0: i32, %arg1: i32, %arg2: i32) -> (i32, i32) {
    %c0_i32 = arith.constant 0 : i32
    return %arg0, %arg2 : i32, i32
  }
  func.func @transform_1(%arg0: i32, %arg1: i32, %arg2: i32) -> (i32, i32) {
    %c0_i32 = arith.constant 0 : i32
    return %arg2, %arg1 : i32, i32
  }
  func.func @transform_2(%arg0: i32, %arg1: i32, %arg2: i32) -> (i32, i32) {
    %c0_i32 = arith.constant 0 : i32
    return %arg0, %arg1 : i32, i32
  }
}

</mosaic_0001>

<bundles_post_ra>
// kernel: tpu_custom_call.1
= control target key start
LH: loop header
LB: loop body
LE: loop exit
PB: predicated region body
PF: predicated region fallthrough
CT: control target
= control target key end

     0   :  { %7 = vsyncpa [#allocation4], 0  ;;  %s2358_s0 = inlined_call_operand.hbm [shape: bf16[512,256], index: 0, kind: input, shape index: {}]   ;;  %s2359_s1 = inlined_call_operand.hbm [shape: bf16[256,256], index: 1, kind: input, shape index: {}]   ;;  %s2360_s2 = inlined_call_operand.hbm [shape: f32[512,256], index: 2, kind: output, shape index: {}]  }
   0x1   :  { %9 = vsyncpa [#allocation4 + $0x1], 0 }
   0x2   :  { %10 = vsyncpa [#allocation7], 0 }
   0x3   :  { %11 = vsyncpa [#allocation5], 0 }
   0x4   :  { %13 = vsyncpa [#allocation5 + $0x1], 0  ;;  %s2069_s9 = smov 0   ;;  %s2071_s10 = smov 0  }
   0x5   :  { %s2073_s11 = smov 0   ;;  %s2075_s12 = smov 0  }
   0x6   :  { %s2077_s13 = smov 0   ;;  %s2079_s14 = smov 0  }
   0x7 LB: > { %s1481_s15 = sadd.s32 4294967295, %s2047_s14   ;;  %s1482_s16 = sadd.s32 4294967294, %s2047_s14   ;;  %s2047_s14 = sphi %s2079_s14, %s19_s14   ;;  %s2043_s13 = sphi %s2077_s13, %s2372_s13   ;;  %s2039_s12 = sphi %s2075_s12, %s2371_s12   ;;  %s2035_s11 = sphi %s2073_s11, %s2370_s11   ;;  %s2031_s10 = sphi %s2071_s10, %s2369_s10   ;;  %s2027_s9 = sphi %s2069_s9, %s2368_s9  }
   0x8   : > { %p60_p0 = scmp.ne.s32.totalorder %s2031_s10, %s2027_s9  ;;  %p2103_p1 = scmp.eq.s32.totalorder %s1481_s15, 0 }
   0x9   : > { %p2107_p2 = scmp.eq.s32.totalorder %s1481_s15, 1  ;;  %p120_p3 = scmp.eq.s32.totalorder %s1482_s16, 1 }
   0xa   : > { %p2113_p4 = por %p2103_p1, %p60_p0  ;;  %p1483_p5 = scmp.ge.s32.totalorder %s2047_s14, 1 }
   0xb   : > { %p2118_p6 = por %p120_p3, %p60_p0  ;;  %p127_p7 = scmp.lt.s32.totalorder %s2047_s14, 3 }
   0xc   : > { %s144_s23 = sshll.u32 %s2359_s1, 4  ;;  %s2049_s25 = smov [#allocation6]   ;;  %s145_s23 = int_to_ptr.hbm [resolvable:$true] %s144_s23 }
   0xd   : > { %p2126_p8 = pnand %p1483_p5, %p127_p7  ;;  %s146_s26 = sshll.u32 %s2049_s25, 4  ;;  %s147_s26 = int_to_ptr.vmem [resolvable:$true] %s146_s26 }
   0xe   : > { %p1485_p11 = scmp.ge.s32.totalorder %s2047_s14, 2  ;;  %s2050_s27 = smov 128  }
   0xf   : > { %p1832_p9 = pneg %p2126_p8  ;;  %s2051_s28 = smov 8  }
  0x10   : > { %s38_s29 = sadd.s32 1, %s2043_s13  ;;  %s47_s30 = sadd.s32 1, %s2035_s11 }
  0x11   : > { %p1833_p10 = pnand %p1832_p9, %p2103_p1  ;;  %p40_p12 = scmp.ge.s32.totalorder %s38_s29, 2 }
  0x12   : > { %p54_p13 = scmp.ne.s32.totalorder %s2035_s11, %s2031_s10  ;;  %p55_p0 = scmp.eq.s32.totalorder %s2047_s14, 0 }
  0x13   : > { %1835 = dma.hbm_to_vmem [thread:$0]  (!%p1833_p10), %s145_s23, 4096, %s147_s26, [#allocation7], %s2050_s27, %s2050_s27, %s2051_s28  }
  0x14   : > { %s2374_s29 = smov (%p40_p12, %s38_s29), 0  ;;  %p2145_p3 = por %p55_p0, %p54_p13 }
  0x15   : > { %p2151_p5 = por %p2107_p2, %p54_p13  ;;  %s42_s5 = ssub.s32 %s2043_s13, %s2374_s29 }
  0x16   : > { %p1845_p7 = scmp.lt.s32.totalorder %s2047_s14, 2  ;;  %p45_p9 = scmp.eq.s32.totalorder %s42_s5, 0 }
  0x17   : > { %s160_s6 = sand.u32 1, %s2035_s11   ;;  %s1757_s15 = sshll.u32 %s2043_s13, 8 }
  0x18   : > { %s1486_s7 = sshll.u32 %s160_s6, 8  ;;  %s172_s22 = scalar_lea.hbm %s2358_s0, %s1757_s15 }
  0x19   : > { %s2160_s8 = scalar_select %p45_p9, %s2035_s11, %s47_s30  }
  0x1a   : > { %s164_s23 = scalar_lea.vmem [#allocation3], %s1486_s7  ;;  %s173_s18 = sshll.u32 %s172_s22, 4  ;;  %s174_s18 = int_to_ptr.hbm [resolvable:$true] %s173_s18 }
  0x1b   : > { %s175_s25 = sshll.u32 %s164_s23, 4  ;;  %p1837_p2 = pnand %p1845_p7, %p2145_p3  ;;  %s176_s25 = int_to_ptr.vmem [resolvable:$true] %s175_s25 }
  0x1c   : > { %s161_s26 = scalar_lea.sflag [#allocation4], %s160_s6  ;;  %187 = sbr.rel (%p2126_p8) target bundleno = 459 (0x1cb), region = 28 }
  0x1d   : > { %1839 = dma.hbm_to_vmem [thread:$0]  (!%p1837_p2), %s174_s18, 4096, %s176_s25, %s161_s26, %s2050_s27, %s2050_s27, %s2051_s28  }
  0x1e   : > { %s2174_s30 = sand.u32 (!%p2126_p8), 1, %s2031_s10  }
  0x1f   : > { %s1491_s5 = sshll.u32 (!%p2126_p8), %s2174_s30, 8  ;;  %s190_s7 = scalar_lea.sflag (!%p2126_p8), [#allocation4], %s2174_s30 }
  0x20   : > { %s2178_s15 = scalar_lea.vmem (!%p2126_p8), [#allocation3], %s1491_s5 }
  0x21   : > { %2014 = dma.done.wait (%p2113_p4), %s190_s7, 4096  }
  0x22   : > { %2016 = vsyncadd (%p2113_p4), %s190_s7, 4294963200 }
  0x23   : > { %2018 = dma.done.wait (%p2103_p1), [#allocation7], 4096  }
  0x24   : > { %2020 = vsyncadd (%p2103_p1), [#allocation7], 4294963200  ;;  %v1680_v0 = vld [vmem:[#allocation6 + $0x70] sm:$0xf]  ;;  %v1805_v1 = vld [vmem:[#allocation6 + $0x74] sm:$0xf0] }
  0x25   : > { %v1744_v2 = vld [vmem:[#allocation6 + $0xf0] sm:$0xf]  ;;  %v1681_v3 = vor.u32 %v1805_v1, %v1680_v0  ;;  %v1821_v4 = vld [vmem:[#allocation6 + $0xf4] sm:$0xf0]  ;;  %v1804_v5 = vld [vmem:[#allocation6 + $0x74] sm:$0xf] }
  0x26   : > { %v1682_v6 = vld [vmem:[#allocation6 + $0x78] sm:$0xf0]  ;;  %v1745_v7 = vor.u32 %v1821_v4, %v1744_v2  ;;  %v1820_v9 = vld [vmem:[#allocation6 + $0xf4] sm:$0xf]  ;;  %v1672_v11 = vld [vmem:[#allocation6 + $0x60] sm:$0xf] }
  0x27   : > { %v1685_v8 = vor.u32 %v1804_v5, %v1682_v6  ;;  %v1746_v10 = vld [vmem:[#allocation6 + $0xf8] sm:$0xf0]  ;;  %742 = vmatpush.bf16.msra.mxu0 %v1681_v3  ;;  %v1803_v13 = vld [vmem:[#allocation6 + $0x64] sm:$0xf0]  ;;  %v1736_v14 = vld [vmem:[#allocation6 + $0xe0] sm:$0xf] }
  0x28   : > { %v1749_v12 = vor.u32 %v1820_v9, %v1746_v10  ;;  %v1819_v15 = vld [vmem:[#allocation6 + $0xe4] sm:$0xf0]  ;;  %831 = vmatpush.bf16.msra.mxu1 %v1745_v7  ;;  %v1673_v16 = vor.u32 %v1803_v13, %v1672_v11  ;;  %v1802_v18 = vld [vmem:[#allocation6 + $0x64] sm:$0xf]  ;;  %v1674_v19 = vld [vmem:[#allocation6 + $0x68] sm:$0xf0] }
  0x29   : > { %920 = vmatpush.bf16.msra.mxu2 %v1685_v8  ;;  %v1737_v17 = vor.u32 %v1819_v15, %v1736_v14  ;;  %v1818_v20 = vld [vmem:[#allocation6 + $0xe4] sm:$0xf]  ;;  %v1677_v21 = vor.u32 %v1802_v18, %v1674_v19  ;;  %v1738_v22 = vld [vmem:[#allocation6 + $0xe8] sm:$0xf0]  ;;  %v1664_v23 = vld [vmem:[#allocation6 + $0x50] sm:$0xf] }
  0x2a   : > { %1009 = vmatpush.bf16.msra.mxu3 %v1749_v12  ;;  %v1801_v24 = vld [vmem:[#allocation6 + $0x54] sm:$0xf0]  ;;  %v1741_v25 = vor.u32 %v1818_v20, %v1738_v22  ;;  %v1728_v26 = vld [vmem:[#allocation6 + $0xd0] sm:$0xf]  ;;  %v1800_v28 = vld [vmem:[#allocation6 + $0x54] sm:$0xf] }
  0x2b   : > { %v1817_v27 = vld [vmem:[#allocation6 + $0xd4] sm:$0xf0]  ;;  %743 = vmatpush.bf16.msra.mxu0 %v1673_v16  ;;  %v1665_v29 = vor.u32 %v1801_v24, %v1664_v23  ;;  %v1666_v30 = vld [vmem:[#allocation6 + $0x58] sm:$0xf0]  ;;  %v1816_v31 = vld [vmem:[#allocation6 + $0xd4] sm:$0xf] }
  0x2c   : > { %v1730_v32 = vld [vmem:[#allocation6 + $0xd8] sm:$0xf0]  ;;  %832 = vmatpush.bf16.msra.mxu1 %v1737_v17  ;;  %v1729_v33 = vor.u32 %v1817_v27, %v1728_v26  ;;  %v1669_v34 = vor.u32 %v1800_v28, %v1666_v30  ;;  %v1656_v35 = vld [vmem:[#allocation6 + $0x40] sm:$0xf]  ;;  %v1799_v36 = vld [vmem:[#allocation6 + $0x44] sm:$0xf0] }
  0x2d   : > { %921 = vmatpush.bf16.msra.mxu2 %v1677_v21  ;;  %v1720_v37 = vld [vmem:[#allocation6 + $0xc0] sm:$0xf]  ;;  %v1733_v38 = vor.u32 %v1816_v31, %v1730_v32  ;;  %v1815_v39 = vld [vmem:[#allocation6 + $0xc4] sm:$0xf0]  ;;  %v1798_v40 = vld [vmem:[#allocation6 + $0x44] sm:$0xf]  ;;  %v1657_v44 = vor.u32 %v1799_v36, %v1656_v35 }
  0x2e   : > { %1010 = vmatpush.bf16.msra.mxu3 %v1741_v25  ;;  %v1658_v41 = vld [vmem:[#allocation6 + $0x48] sm:$0xf0]  ;;  %v1814_v42 = vld [vmem:[#allocation6 + $0xc4] sm:$0xf]  ;;  %v1721_v45 = vor.u32 %v1815_v39, %v1720_v37  ;;  %v1648_v47 = vld [vmem:[#allocation6 + $0x30] sm:$0xf] }
  0x2f   : > { %v1722_v43 = vld [vmem:[#allocation6 + $0xc8] sm:$0xf0]  ;;  %744 = vmatpush.bf16.msra.mxu0 %v1665_v29  ;;  %v1661_v46 = vor.u32 %v1798_v40, %v1658_v41  ;;  %v1797_v48 = vld [vmem:[#allocation6 + $0x34] sm:$0xf0]  ;;  %v1712_v49 = vld [vmem:[#allocation6 + $0xb0] sm:$0xf] }
  0x30   : > { %833 = vmatpush.bf16.msra.mxu1 %v1729_v33  ;;  %v1725_v50 = vor.u32 %v1814_v42, %v1722_v43  ;;  %v1813_v51 = vld [vmem:[#allocation6 + $0xb4] sm:$0xf0]  ;;  %v1796_v52 = vld [vmem:[#allocation6 + $0x34] sm:$0xf]  ;;  %v1650_v53 = vld [vmem:[#allocation6 + $0x38] sm:$0xf0]  ;;  %v1649_v56 = vor.u32 %v1797_v48, %v1648_v47 }
  0x31   : > { %922 = vmatpush.bf16.msra.mxu2 %v1669_v34  ;;  %v1812_v54 = vld [vmem:[#allocation6 + $0xb4] sm:$0xf]  ;;  %v1714_v55 = vld [vmem:[#allocation6 + $0xb8] sm:$0xf0]  ;;  %v1713_v57 = vor.u32 %v1813_v51, %v1712_v49  ;;  %v1653_v58 = vor.u32 %v1796_v52, %v1650_v53  ;;  %v1640_v59 = vld [vmem:[#allocation6 + $0x20] sm:$0xf] }
  0x32   : > { %1011 = vmatpush.bf16.msra.mxu3 %v1733_v38  ;;  %v1795_v60 = vld [vmem:[#allocation6 + $0x24] sm:$0xf0]  ;;  %v1704_v61 = vld [vmem:[#allocation6 + $0xa0] sm:$0xf]  ;;  %v1717_v62 = vor.u32 %v1812_v54, %v1714_v55  ;;  %v1794_v0 = vld [vmem:[#allocation6 + $0x24] sm:$0xf] }
  0x33   : > { %745 = vmatpush.bf16.msra.mxu0 %v1657_v44  ;;  %v1811_v63 = vld [vmem:[#allocation6 + $0xa4] sm:$0xf0]  ;;  %v1642_v1 = vld [vmem:[#allocation6 + $0x28] sm:$0xf0]  ;;  %v1810_v2 = vld [vmem:[#allocation6 + $0xa4] sm:$0xf]  ;;  %v1641_v4 = vor.u32 %v1795_v60, %v1640_v59 }
  0x34   : > { %834 = vmatpush.bf16.msra.mxu1 %v1721_v45  ;;  %v1706_v3 = vld [vmem:[#allocation6 + $0xa8] sm:$0xf0]  ;;  %v1705_v5 = vor.u32 %v1811_v63, %v1704_v61  ;;  %v1645_v6 = vor.u32 %v1794_v0, %v1642_v1  ;;  %v1632_v7 = vld [vmem:[#allocation6 + $0x10] sm:$0xf]  ;;  %v1793_v8 = vld [vmem:[#allocation6 + $0x14] sm:$0xf0] }
  0x35   : > { %923 = vmatpush.bf16.msra.mxu2 %v1661_v46  ;;  %v1696_v9 = vld [vmem:[#allocation6 + $0x90] sm:$0xf]  ;;  %v1709_v10 = vor.u32 %v1810_v2, %v1706_v3  ;;  %v1809_v11 = vld [vmem:[#allocation6 + $0x94] sm:$0xf0]  ;;  %v1792_v12 = vld [vmem:[#allocation6 + $0x14] sm:$0xf]  ;;  %v1633_v16 = vor.u32 %v1793_v8, %v1632_v7 }
  0x36   : > { %1012 = vmatpush.bf16.msra.mxu3 %v1725_v50  ;;  %v1634_v13 = vld [vmem:[#allocation6 + $0x18] sm:$0xf0]  ;;  %v1808_v14 = vld [vmem:[#allocation6 + $0x94] sm:$0xf]  ;;  %v1697_v17 = vor.u32 %v1809_v11, %v1696_v9  ;;  %v1624_v19 = vld [vmem:[#allocation6] sm:$0xf] }
  0x37   : > { %746 = vmatpush.bf16.msra.mxu0 %v1649_v56  ;;  %v1698_v15 = vld [vmem:[#allocation6 + $0x98] sm:$0xf0]  ;;  %v1637_v18 = vor.u32 %v1792_v12, %v1634_v13  ;;  %v1791_v20 = vld [vmem:[#allocation6 + $0x4] sm:$0xf0]  ;;  %v1688_v21 = vld [vmem:[#allocation6 + $0x80] sm:$0xf] }
  0x38   : > { %835 = vmatpush.bf16.msra.mxu1 %v1713_v57  ;;  %v1701_v22 = vor.u32 %v1808_v14, %v1698_v15  ;;  %v1807_v23 = vld [vmem:[#allocation6 + $0x84] sm:$0xf0]  ;;  %v1790_v24 = vld [vmem:[#allocation6 + $0x4] sm:$0xf]  ;;  %v1626_v25 = vld [vmem:[#allocation6 + $0x8] sm:$0xf0]  ;;  %v1625_v28 = vor.u32 %v1791_v20, %v1624_v19 }
  0x39   : > { %924 = vmatpush.bf16.msra.mxu2 %v1653_v58  ;;  %v1806_v26 = vld [vmem:[#allocation6 + $0x84] sm:$0xf]  ;;  %v1690_v27 = vld [vmem:[#allocation6 + $0x88] sm:$0xf0]  ;;  %v1496_v29 = vld [vmem:[%s2178_s15] sm:$0xf]  ;;  %v1689_v31 = vor.u32 %v1807_v23, %v1688_v21  ;;  %v1629_v32 = vor.u32 %v1790_v24, %v1626_v25 }
  0x3a   : > { %1013 = vmatpush.bf16.msra.mxu3 %v1717_v62  ;;  %v1759_v30 = vld [vmem:[%s2178_s15 + $0x4] sm:$0xf0]  ;;  %v1758_v33 = vld [vmem:[%s2178_s15 + $0x4] sm:$0xf]  ;;  %v1498_v34 = vld [vmem:[%s2178_s15 + $0x8] sm:$0xf0]  ;;  %v1693_v35 = vor.u32 %v1806_v26, %v1690_v27 }
  0x3b   : > { %747 = vmatpush.bf16.msra.mxu0 %v1641_v4  ;;  %v1497_v36 = vor.u32 %v1759_v30, %v1496_v29  ;;  %v1501_v37 = vor.u32 %v1758_v33, %v1498_v34  ;;  %v1504_v38 = vld [vmem:[%s2178_s15 + $0x10] sm:$0xf]  ;;  %v1761_v39 = vld [vmem:[%s2178_s15 + $0x14] sm:$0xf0]  ;;  %v1760_v40 = vld [vmem:[%s2178_s15 + $0x14] sm:$0xf] }
  0x3c   : > { %836 = vmatpush.bf16.msra.mxu1 %v1705_v5  ;;  %v1506_v41 = vld [vmem:[%s2178_s15 + $0x18] sm:$0xf0]  ;;  %v1505_v42 = vor.u32 %v1761_v39, %v1504_v38  ;;  %v1512_v44 = vld [vmem:[%s2178_s15 + $0x20] sm:$0xf]  ;;  %v1763_v45 = vld [vmem:[%s2178_s15 + $0x24] sm:$0xf0] }
  0x3d   : > { %925 = vmatpush.bf16.msra.mxu2 %v1645_v6  ;;  %v1509_v43 = vor.u32 %v1760_v40, %v1506_v41  ;;  %v1762_v46 = vld [vmem:[%s2178_s15 + $0x24] sm:$0xf]  ;;  %v1514_v47 = vld [vmem:[%s2178_s15 + $0x28] sm:$0xf0]  ;;  %v1513_v48 = vor.u32 %v1763_v45, %v1512_v44  ;;  %v1520_v50 = vld [vmem:[%s2178_s15 + $0x30] sm:$0xf] }
  0x3e   : > { %1014 = vmatpush.bf16.msra.mxu3 %v1709_v10  ;;  %v1517_v49 = vor.u32 %v1762_v46, %v1514_v47  ;;  %v1765_v51 = vld [vmem:[%s2178_s15 + $0x34] sm:$0xf0]  ;;  %v1764_v52 = vld [vmem:[%s2178_s15 + $0x34] sm:$0xf]  ;;  %v1522_v53 = vld [vmem:[%s2178_s15 + $0x38] sm:$0xf0] }
  0x3f   : > { %748 = vmatpush.bf16.msra.mxu0 %v1633_v16  ;;  %v1521_v54 = vor.u32 %v1765_v51, %v1520_v50  ;;  %v1525_v55 = vor.u32 %v1764_v52, %v1522_v53  ;;  %v1528_v56 = vld [vmem:[%s2178_s15 + $0x40] sm:$0xf]  ;;  %v1767_v57 = vld [vmem:[%s2178_s15 + $0x44] sm:$0xf0]  ;;  %v1766_v58 = vld [vmem:[%s2178_s15 + $0x44] sm:$0xf] }
  0x40   : > { %837 = vmatpush.bf16.msra.mxu1 %v1697_v17  ;;  %v1530_v59 = vld [vmem:[%s2178_s15 + $0x48] sm:$0xf0]  ;;  %v1529_v60 = vor.u32 %v1767_v57, %v1528_v56  ;;  %v1536_v62 = vld [vmem:[%s2178_s15 + $0x50] sm:$0xf]  ;;  %v1769_v63 = vld [vmem:[%s2178_s15 + $0x54] sm:$0xf0] }
  0x41   : > { %926 = vmatpush.bf16.msra.mxu2 %v1637_v18  ;;  %v1533_v61 = vor.u32 %v1766_v58, %v1530_v59  ;;  %v1768_v0 = vld [vmem:[%s2178_s15 + $0x54] sm:$0xf]  ;;  %v1538_v1 = vld [vmem:[%s2178_s15 + $0x58] sm:$0xf0]  ;;  %v1537_v2 = vor.u32 %v1769_v63, %v1536_v62  ;;  %v1544_v4 = vld [vmem:[%s2178_s15 + $0x60] sm:$0xf] }
  0x42   : > { %1015 = vmatpush.bf16.msra.mxu3 %v1701_v22  ;;  %v1541_v3 = vor.u32 %v1768_v0, %v1538_v1  ;;  %v1771_v5 = vld [vmem:[%s2178_s15 + $0x64] sm:$0xf0]  ;;  %v1770_v6 = vld [vmem:[%s2178_s15 + $0x64] sm:$0xf]  ;;  %v1546_v7 = vld [vmem:[%s2178_s15 + $0x68] sm:$0xf0] }
  0x43   : > { %749 = vmatpush.bf16.msra.mxu0 %v1625_v28  ;;  %v1545_v8 = vor.u32 %v1771_v5, %v1544_v4  ;;  %v1549_v9 = vor.u32 %v1770_v6, %v1546_v7  ;;  %v1552_v10 = vld [vmem:[%s2178_s15 + $0x70] sm:$0xf]  ;;  %v1773_v11 = vld [vmem:[%s2178_s15 + $0x74] sm:$0xf0]  ;;  %v1772_v12 = vld [vmem:[%s2178_s15 + $0x74] sm:$0xf] }
  0x44   : > { %838 = vmatpush.bf16.msra.mxu1 %v1689_v31  ;;  %v1554_v13 = vld [vmem:[%s2178_s15 + $0x78] sm:$0xf0]  ;;  %v1553_v14 = vor.u32 %v1773_v11, %v1552_v10  ;;  %v1560_v16 = vld [vmem:[%s2178_s15 + $0x80] sm:$0xf]  ;;  %v1775_v17 = vld [vmem:[%s2178_s15 + $0x84] sm:$0xf0] }
  0x45   : > { %927 = vmatpush.bf16.msra.mxu2 %v1629_v32  ;;  %v1557_v15 = vor.u32 %v1772_v12, %v1554_v13  ;;  %v1774_v18 = vld [vmem:[%s2178_s15 + $0x84] sm:$0xf]  ;;  %v1562_v19 = vld [vmem:[%s2178_s15 + $0x88] sm:$0xf0]  ;;  %s1493_s17 = sshll.u32 %s2174_s30, 9  ;;  %v1561_v20 = vor.u32 %v1775_v17, %v1560_v16  ;;  %s1823_s24 = sshll.u32 %s2039_s12, 9 }
  0x46   : > { %1016 = vmatpush.bf16.msra.mxu3 %v1693_v35  ;;  %750 = vmatmul.bf16.vlgmr.msra.gmra.mxu0 %v1497_v36  ;;  %v1565_v22 = vor.u32 %v1774_v18, %v1562_v19  ;;  %s2225_s19 = scalar_lea.vmem [#allocation8], %s1493_s17  ;;  %v1568_v31 = vld [vmem:[%s2178_s15 + $0x90] sm:$0xf]  ;;  %v1777_v32 = vld [vmem:[%s2178_s15 + $0x94] sm:$0xf0]  ;;  %s1372_s3 = scalar_lea.hbm %s2360_s2, %s1823_s24 }
  0x47   : > { %839 = vmatmul.bf16.vlgmr.msra.gmra.mxu1 %v1501_v37  ;;  %v1776_v33 = vld [vmem:[%s2178_s15 + $0x94] sm:$0xf]  ;;  %v1570_v34 = vld [vmem:[%s2178_s15 + $0x98] sm:$0xf0]  ;;  %v1779_v50 = vld [vmem:[%s2178_s15 + $0xa4] sm:$0xf0] }
  0x48   : > { %928 = vmatmul.bf16.vlgmr.msra.gmra.mxu2 %v1497_v36  ;;  %v1569_v36 = vor.u32 %v1777_v32, %v1568_v31  ;;  %v1573_v39 = vor.u32 %v1776_v33, %v1570_v34  ;;  %v1778_v51 = vld [vmem:[%s2178_s15 + $0xa4] sm:$0xf]  ;;  %v1578_v52 = vld [vmem:[%s2178_s15 + $0xa8] sm:$0xf0]  ;;  %v1781_v4 = vld [vmem:[%s2178_s15 + $0xb4] sm:$0xf0] }
  0x49   : > { %1017 = vmatmul.bf16.vlgmr.msra.gmra.mxu3 %v1501_v37  ;;  %v1581_v57 = vor.u32 %v1778_v51, %v1578_v52  ;;  %v1780_v5 = vld [vmem:[%s2178_s15 + $0xb4] sm:$0xf]  ;;  %v1586_v6 = vld [vmem:[%s2178_s15 + $0xb8] sm:$0xf0]  ;;  %s1373_s6 = sshll.u32 %s2225_s19, 4  ;;  %s1375_s16 = sshll.u32 %s1372_s3, 4  ;;  %s1374_s6 = int_to_ptr.vmem [resolvable:$true] %s1373_s6  ;;  %s1376_s16 = int_to_ptr.hbm [resolvable:$true] %s1375_s16 }
  0x4a   : > { %v1589_v11 = vor.u32 %v1780_v5, %v1586_v6  ;;  %s1358_s12 = scalar_lea.sflag [#allocation5], %s2174_s30  ;;  %s1975_s21 = sshra.s32 %s1376_s16, 4  ;;  %s1976_s21 = int_to_ptr.hbm [resolvable:$true] %s1975_s21 }
  0x4b   : > { %s1977_s22 = scalar_lea.hbm %s1976_s21, 512  ;;  %s1981_s18 = scalar_lea.hbm %s2360_s2, 1024 }
  0x4c   : > { %p1978_p1 = scmp.ne.s32.totalorder %s1976_s21, %s1977_s22  ;;  %p1982_p10 = scmp.lt.s32.totalorder %s1976_s21, %s2360_s2 }
  0x4d   : > { %p1983_p12 = scmp.lt.s32.totalorder %s1981_s18, %s1977_s22 }
  0x4e   : > { %p1979_p4 = pnand %p1978_p1, %p2151_p5 }
  0x4f   : > { %p1984_p13 = por %p1983_p12, %p1982_p10 }
  0x50   : > { %p1980_p8 = pneg %p1979_p4 }
  0x52   : > { %p1985_p0 = pnand %p1984_p13, %p1980_p8 }
  0x56   : > { %755 = vmatmul.bf16.gmra.mxu0 %v1505_v42 }
  0x57   : > { %844 = vmatmul.bf16.gmra.mxu1 %v1509_v43 }
  0x58   : > { %933 = vmatmul.bf16.gmra.mxu2 %v1505_v42 }
  0x59   : > { %1022 = vmatmul.bf16.gmra.mxu3 %v1509_v43 }
  0x66   : > { %760 = vmatmul.bf16.gmra.mxu0 %v1513_v48 }
  0x67   : > { %849 = vmatmul.bf16.gmra.mxu1 %v1517_v49 }
  0x68   : > { %938 = vmatmul.bf16.gmra.mxu2 %v1513_v48 }
  0x69   : > { %1027 = vmatmul.bf16.gmra.mxu3 %v1517_v49  ;;  %v1576_v49 = vld [vmem:[%s2178_s15 + $0xa0] sm:$0xf] }
  0x76   : > { %765 = vmatmul.bf16.gmra.mxu0 %v1521_v54 }
  0x77   : > { %854 = vmatmul.bf16.gmra.mxu1 %v1525_v55 }
  0x78   : > { %943 = vmatmul.bf16.gmra.mxu2 %v1521_v54  ;;  %v1577_v54 = vor.u32 %v1779_v50, %v1576_v49 }
  0x79   : > { %1032 = vmatmul.bf16.gmra.mxu3 %v1525_v55 }
  0x86   : > { %770 = vmatmul.bf16.gmra.mxu0 %v1529_v60 }
  0x87   : > { %859 = vmatmul.bf16.gmra.mxu1 %v1533_v61 }
  0x88   : > { %948 = vmatmul.bf16.gmra.mxu2 %v1529_v60 }
  0x89   : > { %1037 = vmatmul.bf16.gmra.mxu3 %v1533_v61 }
  0x96   : > { %775 = vmatmul.bf16.gmra.mxu0 %v1537_v2 }
  0x97   : > { %864 = vmatmul.bf16.gmra.mxu1 %v1541_v3 }
  0x98   : > { %953 = vmatmul.bf16.gmra.mxu2 %v1537_v2 }
  0x99   : > { %1042 = vmatmul.bf16.gmra.mxu3 %v1541_v3  ;;  %v1584_v3 = vld [vmem:[%s2178_s15 + $0xb0] sm:$0xf] }
  0xa6   : > { %780 = vmatmul.bf16.gmra.mxu0 %v1545_v8 }
  0xa7   : > { %869 = vmatmul.bf16.gmra.mxu1 %v1549_v9 }
  0xa8   : > { %958 = vmatmul.bf16.gmra.mxu2 %v1545_v8  ;;  %v1585_v8 = vor.u32 %v1781_v4, %v1584_v3 }
  0xa9   : > { %1047 = vmatmul.bf16.gmra.mxu3 %v1549_v9 }
  0xb6   : > { %785 = vmatmul.bf16.gmra.mxu0 %v1553_v14 }
  0xb7   : > { %874 = vmatmul.bf16.gmra.mxu1 %v1557_v15 }
  0xb8   : > { %963 = vmatmul.bf16.gmra.mxu2 %v1553_v14 }
  0xb9   : > { %1052 = vmatmul.bf16.gmra.mxu3 %v1557_v15 }
  0xc3   : > { %v751_v21 = vpop.f32.mrf.mxu0 }
  0xc4   : > { %v840_v23 = vpop.f32.mrf.mxu1 }
  0xc5   : > { %v841_v24 = vadd.f32 %v840_v23, %v751_v21  ;;  %v1592_v21 = vld [vmem:[%s2178_s15 + $0xc0] sm:$0xf]  ;;  %v1782_v23 = vld [vmem:[%s2178_s15 + $0xc4] sm:$0xf] }
  0xc6   : > { %790 = vmatmul.bf16.gmra.mxu0 %v1561_v20 }
  0xc7   : > { %1293 = vst [vmem:[%s2225_s19] sm:$0xff] %v841_v24  ;;  %879 = vmatmul.bf16.gmra.mxu1 %v1565_v22  ;;  %v1594_v24 = vld [vmem:[%s2178_s15 + $0xc8] sm:$0xf0] }
  0xc8   : > { %968 = vmatmul.bf16.gmra.mxu2 %v1561_v20 }
  0xc9   : > { %1057 = vmatmul.bf16.gmra.mxu3 %v1565_v22  ;;  %v1783_v22 = vld [vmem:[%s2178_s15 + $0xc4] sm:$0xf0] }
  0xcb   : > { %v929_v25 = vpop.f32.mrf.mxu2  ;;  %v753_v27 = vpop.f32.mrf.mxu0 }
  0xcc   : > { %v1018_v26 = vpop.f32.mrf.mxu3  ;;  %v842_v29 = vpop.f32.mrf.mxu1 }
  0xcd   : > { %v1019_v28 = vadd.f32 %v1018_v26, %v929_v25  ;;  %v843_v30 = vadd.f32 %v842_v29, %v753_v27  ;;  %v1593_v26 = vor.u32 %v1783_v22, %v1592_v21  ;;  %v1597_v29 = vor.u32 %v1782_v23, %v1594_v24 }
  0xcf   : > { %1294 = vst [vmem:[%s2225_s19 + $0x8] sm:$0xff] %v1019_v28 }
  0xd0   : > { %1295 = vst [vmem:[%s2225_s19 + $0x10] sm:$0xff] %v843_v30 }
  0xd3   : > { %v931_v35 = vpop.f32.mrf.mxu2  ;;  %v756_v38 = vpop.f32.mrf.mxu0 }
  0xd4   : > { %v1020_v37 = vpop.f32.mrf.mxu3  ;;  %v845_v41 = vpop.f32.mrf.mxu1 }
  0xd5   : > { %v1021_v40 = vadd.f32 %v1020_v37, %v931_v35  ;;  %v846_v42 = vadd.f32 %v845_v41, %v756_v38  ;;  %v1784_v41 = vld [vmem:[%s2178_s15 + $0xd4] sm:$0xf] }
  0xd6   : > { %795 = vmatmul.bf16.gmra.mxu0 %v1569_v36 }
  0xd7   : > { %1296 = vst [vmem:[%s2225_s19 + $0x18] sm:$0xff] %v1021_v40  ;;  %884 = vmatmul.bf16.gmra.mxu1 %v1573_v39  ;;  %v1785_v40 = vld [vmem:[%s2178_s15 + $0xd4] sm:$0xf0] }
  0xd8   : > { %1297 = vst [vmem:[%s2225_s19 + $0x20] sm:$0xff] %v846_v42  ;;  %973 = vmatmul.bf16.gmra.mxu2 %v1569_v36  ;;  %v1602_v42 = vld [vmem:[%s2178_s15 + $0xd8] sm:$0xf0] }
  0xd9   : > { %1062 = vmatmul.bf16.gmra.mxu3 %v1573_v39  ;;  %v1600_v39 = vld [vmem:[%s2178_s15 + $0xd0] sm:$0xf] }
  0xdb   : > { %v934_v43 = vpop.f32.mrf.mxu2  ;;  %v758_v45 = vpop.f32.mrf.mxu0 }
  0xdc   : > { %v1023_v44 = vpop.f32.mrf.mxu3  ;;  %v847_v47 = vpop.f32.mrf.mxu1 }
  0xdd   : > { %v1024_v46 = vadd.f32 %v1023_v44, %v934_v43  ;;  %v848_v48 = vadd.f32 %v847_v47, %v758_v45  ;;  %v1601_v44 = vor.u32 %v1785_v40, %v1600_v39  ;;  %v1605_v47 = vor.u32 %v1784_v41, %v1602_v42 }
  0xdf   : > { %1298 = vst [vmem:[%s2225_s19 + $0x28] sm:$0xff] %v1024_v46 }
  0xe0   : > { %1299 = vst [vmem:[%s2225_s19 + $0x30] sm:$0xff] %v848_v48 }
  0xe3   : > { %v936_v53 = vpop.f32.mrf.mxu2  ;;  %v761_v56 = vpop.f32.mrf.mxu0 }
  0xe4   : > { %v1025_v55 = vpop.f32.mrf.mxu3  ;;  %v850_v59 = vpop.f32.mrf.mxu1 }
  0xe5   : > { %v1026_v58 = vadd.f32 %v1025_v55, %v936_v53  ;;  %v851_v60 = vadd.f32 %v850_v59, %v761_v56  ;;  %v1786_v59 = vld [vmem:[%s2178_s15 + $0xe4] sm:$0xf] }
  0xe6   : > { %800 = vmatmul.bf16.gmra.mxu0 %v1577_v54 }
  0xe7   : > { %1300 = vst [vmem:[%s2225_s19 + $0x38] sm:$0xff] %v1026_v58  ;;  %889 = vmatmul.bf16.gmra.mxu1 %v1581_v57  ;;  %v1787_v58 = vld [vmem:[%s2178_s15 + $0xe4] sm:$0xf0] }
  0xe8   : > { %1301 = vst [vmem:[%s2225_s19 + $0x40] sm:$0xff] %v851_v60  ;;  %978 = vmatmul.bf16.gmra.mxu2 %v1577_v54  ;;  %v1610_v60 = vld [vmem:[%s2178_s15 + $0xe8] sm:$0xf0] }
  0xe9   : > { %1067 = vmatmul.bf16.gmra.mxu3 %v1581_v57  ;;  %v1608_v57 = vld [vmem:[%s2178_s15 + $0xe0] sm:$0xf] }
  0xeb   : > { %v939_v61 = vpop.f32.mrf.mxu2  ;;  %v763_v63 = vpop.f32.mrf.mxu0 }
  0xec   : > { %v1028_v62 = vpop.f32.mrf.mxu3  ;;  %v852_v1 = vpop.f32.mrf.mxu1 }
  0xed   : > { %v1029_v0 = vadd.f32 %v1028_v62, %v939_v61  ;;  %v853_v2 = vadd.f32 %v852_v1, %v763_v63  ;;  %v1609_v62 = vor.u32 %v1787_v58, %v1608_v57  ;;  %v1613_v1 = vor.u32 %v1786_v59, %v1610_v60 }
  0xef   : > { %1302 = vst [vmem:[%s2225_s19 + $0x48] sm:$0xff] %v1029_v0 }
  0xf0   : > { %1303 = vst [vmem:[%s2225_s19 + $0x50] sm:$0xff] %v853_v2 }
  0xf3   : > { %v941_v7 = vpop.f32.mrf.mxu2  ;;  %v766_v10 = vpop.f32.mrf.mxu0 }
  0xf4   : > { %v1030_v9 = vpop.f32.mrf.mxu3  ;;  %v855_v13 = vpop.f32.mrf.mxu1 }
  0xf5   : > { %v1031_v12 = vadd.f32 %v1030_v9, %v941_v7  ;;  %v856_v14 = vadd.f32 %v855_v13, %v766_v10  ;;  %v1788_v13 = vld [vmem:[%s2178_s15 + $0xf4] sm:$0xf] }
  0xf6   : > { %805 = vmatmul.bf16.gmra.mxu0 %v1585_v8 }
  0xf7   : > { %1304 = vst [vmem:[%s2225_s19 + $0x58] sm:$0xff] %v1031_v12  ;;  %894 = vmatmul.bf16.gmra.mxu1 %v1589_v11  ;;  %v1789_v12 = vld [vmem:[%s2178_s15 + $0xf4] sm:$0xf0] }
  0xf8   : > { %1305 = vst [vmem:[%s2225_s19 + $0x60] sm:$0xff] %v856_v14  ;;  %983 = vmatmul.bf16.gmra.mxu2 %v1585_v8  ;;  %v1618_v14 = vld [vmem:[%s2178_s15 + $0xf8] sm:$0xf0] }
  0xf9   : > { %1072 = vmatmul.bf16.gmra.mxu3 %v1589_v11  ;;  %v1616_v11 = vld [vmem:[%s2178_s15 + $0xf0] sm:$0xf] }
  0xfb   : > { %v944_v15 = vpop.f32.mrf.mxu2  ;;  %v768_v17 = vpop.f32.mrf.mxu0 }
  0xfc   : > { %v1033_v16 = vpop.f32.mrf.mxu3  ;;  %v857_v19 = vpop.f32.mrf.mxu1 }
  0xfd   : > { %v1034_v18 = vadd.f32 %v1033_v16, %v944_v15  ;;  %v858_v20 = vadd.f32 %v857_v19, %v768_v17  ;;  %v1617_v16 = vor.u32 %v1789_v12, %v1616_v11  ;;  %v1621_v19 = vor.u32 %v1788_v13, %v1618_v14 }
  0xff   : > { %1306 = vst [vmem:[%s2225_s19 + $0x68] sm:$0xff] %v1034_v18 }
 0x100   : > { %1307 = vst [vmem:[%s2225_s19 + $0x70] sm:$0xff] %v858_v20 }
 0x103   : > { %v946_v25 = vpop.f32.mrf.mxu2  ;;  %v771_v28 = vpop.f32.mrf.mxu0 }
 0x104   : > { %v1035_v27 = vpop.f32.mrf.mxu3  ;;  %v860_v31 = vpop.f32.mrf.mxu1 }
 0x105   : > { %v1036_v30 = vadd.f32 %v1035_v27, %v946_v25  ;;  %v861_v32 = vadd.f32 %v860_v31, %v771_v28 }
 0x106   : > { %810 = vmatmul.bf16.gmra.mxu0 %v1593_v26 }
 0x107   : > { %1308 = vst [vmem:[%s2225_s19 + $0x78] sm:$0xff] %v1036_v30  ;;  %899 = vmatmul.bf16.gmra.mxu1 %v1597_v29 }
 0x108   : > { %1309 = vst [vmem:[%s2225_s19 + $0x80] sm:$0xff] %v861_v32  ;;  %988 = vmatmul.bf16.gmra.mxu2 %v1593_v26 }
 0x109   : > { %1077 = vmatmul.bf16.gmra.mxu3 %v1597_v29 }
 0x10b   : > { %v949_v33 = vpop.f32.mrf.mxu2  ;;  %v773_v35 = vpop.f32.mrf.mxu0 }
 0x10c   : > { %v1038_v34 = vpop.f32.mrf.mxu3  ;;  %v862_v37 = vpop.f32.mrf.mxu1 }
 0x10d   : > { %v1039_v36 = vadd.f32 %v1038_v34, %v949_v33  ;;  %v863_v38 = vadd.f32 %v862_v37, %v773_v35 }
 0x10f   : > { %1310 = vst [vmem:[%s2225_s19 + $0x88] sm:$0xff] %v1039_v36 }
 0x110   : > { %1311 = vst [vmem:[%s2225_s19 + $0x90] sm:$0xff] %v863_v38 }
 0x113   : > { %v951_v43 = vpop.f32.mrf.mxu2  ;;  %v776_v46 = vpop.f32.mrf.mxu0 }
 0x114   : > { %v1040_v45 = vpop.f32.mrf.mxu3  ;;  %v865_v49 = vpop.f32.mrf.mxu1 }
 0x115   : > { %v1041_v48 = vadd.f32 %v1040_v45, %v951_v43  ;;  %v866_v50 = vadd.f32 %v865_v49, %v776_v46 }
 0x116   : > { %815 = vmatmul.bf16.gmra.mxu0 %v1601_v44 }
 0x117   : > { %1312 = vst [vmem:[%s2225_s19 + $0x98] sm:$0xff] %v1041_v48  ;;  %904 = vmatmul.bf16.gmra.mxu1 %v1605_v47 }
 0x118   : > { %1313 = vst [vmem:[%s2225_s19 + $0xa0] sm:$0xff] %v866_v50  ;;  %993 = vmatmul.bf16.gmra.mxu2 %v1601_v44 }
 0x119   : > { %1082 = vmatmul.bf16.gmra.mxu3 %v1605_v47 }
 0x11b   : > { %v954_v51 = vpop.f32.mrf.mxu2  ;;  %v778_v53 = vpop.f32.mrf.mxu0 }
 0x11c   : > { %v1043_v52 = vpop.f32.mrf.mxu3  ;;  %v867_v55 = vpop.f32.mrf.mxu1 }
 0x11d   : > { %v1044_v54 = vadd.f32 %v1043_v52, %v954_v51  ;;  %v868_v56 = vadd.f32 %v867_v55, %v778_v53 }
 0x11f   : > { %1314 = vst [vmem:[%s2225_s19 + $0xa8] sm:$0xff] %v1044_v54 }
 0x120   : > { %1315 = vst [vmem:[%s2225_s19 + $0xb0] sm:$0xff] %v868_v56 }
 0x123   : > { %v956_v61 = vpop.f32.mrf.mxu2  ;;  %v781_v0 = vpop.f32.mrf.mxu0 }
 0x124   : > { %v1045_v63 = vpop.f32.mrf.mxu3  ;;  %v870_v3 = vpop.f32.mrf.mxu1 }
 0x125   : > { %v1046_v2 = vadd.f32 %v1045_v63, %v956_v61  ;;  %v871_v4 = vadd.f32 %v870_v3, %v781_v0 }
 0x126   : > { %820 = vmatmul.bf16.gmra.mxu0 %v1609_v62 }
 0x127   : > { %1316 = vst [vmem:[%s2225_s19 + $0xb8] sm:$0xff] %v1046_v2  ;;  %909 = vmatmul.bf16.gmra.mxu1 %v1613_v1 }
 0x128   : > { %1317 = vst [vmem:[%s2225_s19 + $0xc0] sm:$0xff] %v871_v4  ;;  %998 = vmatmul.bf16.gmra.mxu2 %v1609_v62 }
 0x129   : > { %1087 = vmatmul.bf16.gmra.mxu3 %v1613_v1 }
 0x12b   : > { %v959_v5 = vpop.f32.mrf.mxu2  ;;  %v783_v7 = vpop.f32.mrf.mxu0 }
 0x12c   : > { %v1048_v6 = vpop.f32.mrf.mxu3  ;;  %v872_v9 = vpop.f32.mrf.mxu1 }
 0x12d   : > { %v1049_v8 = vadd.f32 %v1048_v6, %v959_v5  ;;  %v873_v10 = vadd.f32 %v872_v9, %v783_v7 }
 0x12f   : > { %1318 = vst [vmem:[%s2225_s19 + $0xc8] sm:$0xff] %v1049_v8 }
 0x130   : > { %1319 = vst [vmem:[%s2225_s19 + $0xd0] sm:$0xff] %v873_v10 }
 0x133   : > { %v961_v15 = vpop.f32.mrf.mxu2  ;;  %v786_v18 = vpop.f32.mrf.mxu0 }
 0x134   : > { %v1050_v17 = vpop.f32.mrf.mxu3  ;;  %v875_v21 = vpop.f32.mrf.mxu1 }
 0x135   : > { %v1051_v20 = vadd.f32 %v1050_v17, %v961_v15  ;;  %v876_v22 = vadd.f32 %v875_v21, %v786_v18 }
 0x136   : > { %825 = vmatmul.bf16.gmra.mxu0 %v1617_v16 }
 0x137   : > { %1320 = vst [vmem:[%s2225_s19 + $0xd8] sm:$0xff] %v1051_v20  ;;  %914 = vmatmul.bf16.gmra.mxu1 %v1621_v19 }
 0x138   : > { %1321 = vst [vmem:[%s2225_s19 + $0xe0] sm:$0xff] %v876_v22  ;;  %1003 = vmatmul.bf16.gmra.mxu2 %v1617_v16 }
 0x139   : > { %1092 = vmatmul.bf16.gmra.mxu3 %v1621_v19 }
 0x13b   : > { %v964_v23 = vpop.f32.mrf.mxu2  ;;  %v788_v25 = vpop.f32.mrf.mxu0 }
 0x13c   : > { %v1053_v24 = vpop.f32.mrf.mxu3  ;;  %v877_v27 = vpop.f32.mrf.mxu1 }
 0x13d   : > { %v1054_v26 = vadd.f32 %v1053_v24, %v964_v23  ;;  %v878_v28 = vadd.f32 %v877_v27, %v788_v25 }
 0x13f   : > { %1322 = vst [vmem:[%s2225_s19 + $0xe8] sm:$0xff] %v1054_v26 }
 0x140   : > { %1323 = vst [vmem:[%s2225_s19 + $0xf0] sm:$0xff] %v878_v28 }
 0x143   : > { %v966_v29 = vpop.f32.mrf.mxu2  ;;  %v791_v31 = vpop.f32.mrf.mxu0 }
 0x144   : > { %v1055_v30 = vpop.f32.mrf.mxu3  ;;  %v880_v33 = vpop.f32.mrf.mxu1 }
 0x145   : > { %v1056_v32 = vadd.f32 %v1055_v30, %v966_v29  ;;  %v881_v34 = vadd.f32 %v880_v33, %v791_v31 }
 0x147   : > { %1324 = vst [vmem:[%s2225_s19 + $0xf8] sm:$0xff] %v1056_v32 }
 0x148   : > { %1325 = vst [vmem:[%s2225_s19 + $0x100] sm:$0xff] %v881_v34 }
 0x14b   : > { %v969_v35 = vpop.f32.mrf.mxu2  ;;  %v793_v37 = vpop.f32.mrf.mxu0 }
 0x14c   : > { %v1058_v36 = vpop.f32.mrf.mxu3  ;;  %v882_v39 = vpop.f32.mrf.mxu1 }
 0x14d   : > { %v1059_v38 = vadd.f32 %v1058_v36, %v969_v35  ;;  %v883_v40 = vadd.f32 %v882_v39, %v793_v37 }
 0x14f   : > { %1326 = vst [vmem:[%s2225_s19 + $0x108] sm:$0xff] %v1059_v38 }
 0x150   : > { %1327 = vst [vmem:[%s2225_s19 + $0x110] sm:$0xff] %v883_v40 }
 0x153   : > { %v971_v41 = vpop.f32.mrf.mxu2  ;;  %v796_v43 = vpop.f32.mrf.mxu0 }
 0x154   : > { %v1060_v42 = vpop.f32.mrf.mxu3  ;;  %v885_v45 = vpop.f32.mrf.mxu1 }
 0x155   : > { %v1061_v44 = vadd.f32 %v1060_v42, %v971_v41  ;;  %v886_v46 = vadd.f32 %v885_v45, %v796_v43 }
 0x157   : > { %1328 = vst [vmem:[%s2225_s19 + $0x118] sm:$0xff] %v1061_v44 }
 0x158   : > { %1329 = vst [vmem:[%s2225_s19 + $0x120] sm:$0xff] %v886_v46 }
 0x15b   : > { %v974_v47 = vpop.f32.mrf.mxu2  ;;  %v798_v49 = vpop.f32.mrf.mxu0 }
 0x15c   : > { %v1063_v48 = vpop.f32.mrf.mxu3  ;;  %v887_v51 = vpop.f32.mrf.mxu1 }
 0x15d   : > { %v1064_v50 = vadd.f32 %v1063_v48, %v974_v47  ;;  %v888_v52 = vadd.f32 %v887_v51, %v798_v49 }
 0x15f   : > { %1330 = vst [vmem:[%s2225_s19 + $0x128] sm:$0xff] %v1064_v50 }
 0x160   : > { %1331 = vst [vmem:[%s2225_s19 + $0x130] sm:$0xff] %v888_v52 }
 0x163   : > { %v976_v53 = vpop.f32.mrf.mxu2  ;;  %v801_v55 = vpop.f32.mrf.mxu0 }
 0x164   : > { %v1065_v54 = vpop.f32.mrf.mxu3  ;;  %v890_v57 = vpop.f32.mrf.mxu1 }
 0x165   : > { %v1066_v56 = vadd.f32 %v1065_v54, %v976_v53  ;;  %v891_v58 = vadd.f32 %v890_v57, %v801_v55 }
 0x167   : > { %1332 = vst [vmem:[%s2225_s19 + $0x138] sm:$0xff] %v1066_v56 }
 0x168   : > { %1333 = vst [vmem:[%s2225_s19 + $0x140] sm:$0xff] %v891_v58 }
 0x16b   : > { %v979_v59 = vpop.f32.mrf.mxu2  ;;  %v803_v61 = vpop.f32.mrf.mxu0 }
 0x16c   : > { %v1068_v60 = vpop.f32.mrf.mxu3  ;;  %v892_v63 = vpop.f32.mrf.mxu1 }
 0x16d   : > { %v1069_v62 = vadd.f32 %v1068_v60, %v979_v59  ;;  %v893_v0 = vadd.f32 %v892_v63, %v803_v61 }
 0x16f   : > { %1334 = vst [vmem:[%s2225_s19 + $0x148] sm:$0xff] %v1069_v62 }
 0x170   : > { %1335 = vst [vmem:[%s2225_s19 + $0x150] sm:$0xff] %v893_v0 }
 0x173   : > { %v981_v1 = vpop.f32.mrf.mxu2  ;;  %v806_v3 = vpop.f32.mrf.mxu0 }
 0x174   : > { %v1070_v2 = vpop.f32.mrf.mxu3  ;;  %v895_v5 = vpop.f32.mrf.mxu1 }
 0x175   : > { %v1071_v4 = vadd.f32 %v1070_v2, %v981_v1  ;;  %v896_v6 = vadd.f32 %v895_v5, %v806_v3 }
 0x177   : > { %1336 = vst [vmem:[%s2225_s19 + $0x158] sm:$0xff] %v1071_v4 }
 0x178   : > { %1337 = vst [vmem:[%s2225_s19 + $0x160] sm:$0xff] %v896_v6 }
 0x17b   : > { %v984_v7 = vpop.f32.mrf.mxu2  ;;  %v808_v9 = vpop.f32.mrf.mxu0 }
 0x17c   : > { %v1073_v8 = vpop.f32.mrf.mxu3  ;;  %v897_v11 = vpop.f32.mrf.mxu1 }
 0x17d   : > { %v1074_v10 = vadd.f32 %v1073_v8, %v984_v7  ;;  %v898_v12 = vadd.f32 %v897_v11, %v808_v9 }
 0x17f   : > { %1338 = vst [vmem:[%s2225_s19 + $0x168] sm:$0xff] %v1074_v10 }
 0x180   : > { %1339 = vst [vmem:[%s2225_s19 + $0x170] sm:$0xff] %v898_v12 }
 0x183   : > { %v986_v13 = vpop.f32.mrf.mxu2  ;;  %v811_v15 = vpop.f32.mrf.mxu0 }
 0x184   : > { %v1075_v14 = vpop.f32.mrf.mxu3  ;;  %v900_v17 = vpop.f32.mrf.mxu1 }
 0x185   : > { %v1076_v16 = vadd.f32 %v1075_v14, %v986_v13  ;;  %v901_v18 = vadd.f32 %v900_v17, %v811_v15 }
 0x187   : > { %1340 = vst [vmem:[%s2225_s19 + $0x178] sm:$0xff] %v1076_v16 }
 0x188   : > { %1341 = vst [vmem:[%s2225_s19 + $0x180] sm:$0xff] %v901_v18 }
 0x18b   : > { %v989_v19 = vpop.f32.mrf.mxu2  ;;  %v813_v21 = vpop.f32.mrf.mxu0 }
 0x18c   : > { %v1078_v20 = vpop.f32.mrf.mxu3  ;;  %v902_v23 = vpop.f32.mrf.mxu1 }
 0x18d   : > { %v1079_v22 = vadd.f32 %v1078_v20, %v989_v19  ;;  %v903_v24 = vadd.f32 %v902_v23, %v813_v21 }
 0x18f   : > { %1342 = vst [vmem:[%s2225_s19 + $0x188] sm:$0xff] %v1079_v22 }
 0x190   : > { %1343 = vst [vmem:[%s2225_s19 + $0x190] sm:$0xff] %v903_v24 }
 0x193   : > { %v991_v25 = vpop.f32.mrf.mxu2  ;;  %v816_v27 = vpop.f32.mrf.mxu0 }
 0x194   : > { %v1080_v26 = vpop.f32.mrf.mxu3  ;;  %v905_v29 = vpop.f32.mrf.mxu1 }
 0x195   : > { %v1081_v28 = vadd.f32 %v1080_v26, %v991_v25  ;;  %v906_v30 = vadd.f32 %v905_v29, %v816_v27 }
 0x197   : > { %1344 = vst [vmem:[%s2225_s19 + $0x198] sm:$0xff] %v1081_v28 }
 0x198   : > { %1345 = vst [vmem:[%s2225_s19 + $0x1a0] sm:$0xff] %v906_v30 }
 0x19b   : > { %v994_v31 = vpop.f32.mrf.mxu2  ;;  %v818_v33 = vpop.f32.mrf.mxu0 }
 0x19c   : > { %v1083_v32 = vpop.f32.mrf.mxu3  ;;  %v907_v35 = vpop.f32.mrf.mxu1 }
 0x19d   : > { %v1084_v34 = vadd.f32 %v1083_v32, %v994_v31  ;;  %v908_v36 = vadd.f32 %v907_v35, %v818_v33 }
 0x19f   : > { %1346 = vst [vmem:[%s2225_s19 + $0x1a8] sm:$0xff] %v1084_v34 }
 0x1a0   : > { %1347 = vst [vmem:[%s2225_s19 + $0x1b0] sm:$0xff] %v908_v36 }
 0x1a3   : > { %v996_v37 = vpop.f32.mrf.mxu2  ;;  %v821_v39 = vpop.f32.mrf.mxu0 }
 0x1a4   : > { %v1085_v38 = vpop.f32.mrf.mxu3  ;;  %v910_v41 = vpop.f32.mrf.mxu1 }
 0x1a5   : > { %v1086_v40 = vadd.f32 %v1085_v38, %v996_v37  ;;  %v911_v42 = vadd.f32 %v910_v41, %v821_v39 }
 0x1a7   : > { %1348 = vst [vmem:[%s2225_s19 + $0x1b8] sm:$0xff] %v1086_v40 }
 0x1a8   : > { %1349 = vst [vmem:[%s2225_s19 + $0x1c0] sm:$0xff] %v911_v42 }
 0x1ab   : > { %v999_v43 = vpop.f32.mrf.mxu2  ;;  %v823_v45 = vpop.f32.mrf.mxu0 }
 0x1ac   : > { %v1088_v44 = vpop.f32.mrf.mxu3  ;;  %v912_v47 = vpop.f32.mrf.mxu1 }
 0x1ad   : > { %v1089_v46 = vadd.f32 %v1088_v44, %v999_v43  ;;  %v913_v48 = vadd.f32 %v912_v47, %v823_v45 }
 0x1af   : > { %1350 = vst [vmem:[%s2225_s19 + $0x1c8] sm:$0xff] %v1089_v46 }
 0x1b0   : > { %1351 = vst [vmem:[%s2225_s19 + $0x1d0] sm:$0xff] %v913_v48 }
 0x1b3   : > { %v1001_v49 = vpop.f32.mrf.mxu2  ;;  %v826_v51 = vpop.f32.mrf.mxu0 }
 0x1b4   : > { %v1090_v50 = vpop.f32.mrf.mxu3  ;;  %v915_v53 = vpop.f32.mrf.mxu1 }
 0x1b5   : > { %v1091_v52 = vadd.f32 %v1090_v50, %v1001_v49  ;;  %v916_v54 = vadd.f32 %v915_v53, %v826_v51 }
 0x1b7   : > { %1352 = vst [vmem:[%s2225_s19 + $0x1d8] sm:$0xff] %v1091_v52 }
 0x1b8   : > { %1353 = vst [vmem:[%s2225_s19 + $0x1e0] sm:$0xff] %v916_v54 }
 0x1bb   : > { %v1004_v55 = vpop.f32.mrf.mxu2  ;;  %v828_v57 = vpop.f32.mrf.mxu0 }
 0x1bc   : > { %v1093_v56 = vpop.f32.mrf.mxu3  ;;  %v917_v59 = vpop.f32.mrf.mxu1 }
 0x1bd   : > { %v1094_v58 = vadd.f32 %v1093_v56, %v1004_v55  ;;  %v918_v60 = vadd.f32 %v917_v59, %v828_v57 }
 0x1bf   : > { %1354 = vst [vmem:[%s2225_s19 + $0x1e8] sm:$0xff] %v1094_v58 }
 0x1c0   : > { %1355 = vst [vmem:[%s2225_s19 + $0x1f0] sm:$0xff] %v918_v60 }
 0x1c3   : > { %v1006_v61 = vpop.f32.mrf.mxu2 }
 0x1c4   : > { %v1095_v62 = vpop.f32.mrf.mxu3 }
 0x1c5   : > { %v1096_v63 = vadd.f32 %v1095_v62, %v1006_v61 }
 0x1c7   : > { %1356 = vst [vmem:[%s2225_s19 + $0x1f8] sm:$0xff] %v1096_v63 }
 0x1c8   : > { %1988 = shalt.err (!%p1985_p0)
}
 0x1c9   : > { %s2052_s30 = smov 256   ;;  %s2053_s7 = smov 16  }
 0x1ca   : > { %1830 = dma.vmem_to_hbm [thread:$0]  (%p2151_p5), %s1374_s6, 8192, %s1376_s16, %s1358_s12, %s2052_s30, %s2052_s30, %s2053_s7  }
 0x1cb PF: > { %s1390_s15 = sand.u32 1, %s2027_s9   ;;  %p1841_p3 = pnand %p1485_p11, %p2118_p6 }
 0x1cc   : > { %s1391_s17 = scalar_lea.sflag [#allocation5], %s1390_s15 }
 0x1cd   : > { %p1842_p7 = pneg %p1841_p3 }
 0x1cf   : > { %2022 = dma.done.wait (%p1842_p7), %s1391_s17, 8192  }
 0x1d0   : > { %2024 = vsyncadd (%p1842_p7), %s1391_s17, 4294959104  ;;  %s19_s14 = sadd.s32 1, %s2047_s14   ;;  %s2368_s9 = smov %s2031_s10 }
 0x1d1   : > { %p16_p9 = scmp.ge.s32.totalorder %s19_s14, 4   ;;  %s2369_s10 = smov %s2035_s11 }
 0x1d2   : > { %s2370_s11 = smov %s2160_s8  ;;  %s2371_s12 = smov %s2043_s13 }
 0x1d3   : > { %s2372_s13 = smov %s2374_s29  ;;  %18 = sbr.rel (!%p16_p9) target bundleno = 7 (0x7), region = 86 }
 0x1d8   :  { %1397 = vsyncpa [#allocation4], 1 }
 0x1d9   :  { %1399 = vsyncpa [#allocation4 + $0x1], 1 }
 0x1da   :  { %1400 = vsyncpa [#allocation7], 1 }
 0x1db   :  { %1401 = vsyncpa [#allocation5], 1 }
 0x1dc   :  { %1403 = vsyncpa [#allocation5 + $0x1], 1 }

</bundles_post_ra>
